<compile_context>
chip_gen: v5e
topology: v5e:2x2
jax: 0.10.0
libtpu: 0.0.40
codegen_flags: <defaults>
</compile_context>

<pallas_src>
import jax
import jax.numpy as jnp
from jax import lax
from jax.experimental import pallas as pl
from jax.experimental.pallas import tpu as pltpu


def _make_kernel(compute_dtype):
    def kernel(flow_ref, edge_ref, *refs):
        """refs = (wT_0, b_0, ..., wT_L, b_L, out_ref). One grid step = Bb batches."""
        out_ref = refs[-1]
        wb_refs = refs[:-1]
        n_layers = len(wb_refs) // 2
        bb = flow_ref.shape[0]

        # ---- cosine-similarity adjacency ---------------------------------
        x = flow_ref[...].astype(jnp.float32)                      # (Bb, T, N)
        sumsq = jnp.sum(x * x, axis=2, keepdims=True)              # (Bb, T, 1)
        # F.normalize(x, dim=1): x / max(||x||,1e-12) == x * rsqrt(max(||x||^2,1e-24))
        xn = x * lax.rsqrt(jnp.maximum(sumsq, 1e-24))              # (Bb, T, N) f32

        # GCN degrees without materializing adj (f32, O(T*N) two-pass):
        #   deg[b,j] = sum_i adj[b,i,j] = sum_t (sum_i xn[b,t,i]) * xn[b,t,j]
        tot = jnp.sum(xn, axis=2, keepdims=True)                   # (Bb, T, 1)
        deg = jnp.sum(tot * xn, axis=1)                            # (Bb, N)
        # deg > 0 for real data; guard matches the reference (torch pow(-0.5)
        # would NaN on a negative degree, only reachable via fp cancellation).
        d = jnp.where(deg > 0, lax.rsqrt(deg), 0.0)[:, None, :]    # (Bb, 1, N) f32

        # adj[b,i,j] = sum_t xn[b,t,i] * xn[b,t,j]  (symmetric). Transpose the
        # compute-dtype copy (half-width vs the old f32 duplicate) and contract
        # on the minor axis (the flash-attention-style supported pattern).
        xn_c = xn.astype(compute_dtype)
        xnt_c = jnp.swapaxes(xn_c, 1, 2)                           # (Bb, N, T)
        adj = jnp.einsum('bit,bjt->bij', xnt_c, xnt_c,
                         preferred_element_type=jnp.float32)       # (Bb, N, N) f32
        adj = adj.astype(compute_dtype)                            # reused by every layer

        # ---- stacked GCNConv + ReLU, transposed layout (Bb, F, N) ----------
        h = edge_ref[...]                                          # (Bb, E, N)
        for l in range(n_layers):
            wt = wb_refs[2 * l][...]                               # (Fout, Fin), compute dtype
            bias = wb_refs[2 * l + 1][...]                         # (Fout, 1), f32
            wt_b = jnp.broadcast_to(wt, (bb,) + wt.shape)          # tiny, once per layer
            # (H W)^T = W^T @ H^T : (Bb, Fout, N), lane-dense on N.
            hw = jnp.einsum('bgf,bfn->bgn', wt_b, h.astype(compute_dtype),
                            preferred_element_type=jnp.float32)
            hw = (hw * d).astype(compute_dtype)                    # D^{-1/2} (source side)
            # (A_hat @ HW)^T = ((HW)^T D^{-1/2}) @ adj   (adj symmetric)
            agg = jnp.einsum('bgn,bnm->bgm', hw, adj,
                             preferred_element_type=jnp.float32)   # (Bb, Fout, N) f32
            h = jnp.maximum(agg * d + bias[None, :, :], 0.0)       # f32 VPU/EUP math
        out_ref[...] = h                                           # lane-dense store (N on lanes)

    return kernel


def _default_vmem_limit_bytes():
    """~3/4 of physical VMEM: ~96 MiB on v5e/v6e (128 MiB), ~48 MiB on v7x (64 MiB)."""
    cap = None
    try:
        cap = getattr(pltpu.get_tpu_info(), "vmem_capacity_bytes", None)
    except Exception:
        cap = None
    if not cap:
        cap = 64 * 1024 * 1024          # conservative fallback (v7x-sized)
    return min((cap * 3) // 4, 100 * 1024 * 1024)


def _pick_batch_block(B, T, N, E, feat_dims, out_dim, in_bytes, compute_bytes,
                      budget_bytes):
    """Largest divisor of B (capped at B//2) whose per-step VMEM footprint fits."""
    fmax = max(feat_dims)
    # Pallas double-buffers every streamed block (inputs and output):
    io_per_batch = 2 * (T * N * in_bytes            # flow block
                        + E * N * in_bytes          # edge block (transposed)
                        + out_dim * N * 4)          # output block (f32)
    layer_ops = sum(fi * fo for fi, fo in zip(feat_dims[:-1], feat_dims[1:]))
    # Single-buffered in-kernel intermediates:
    inter_per_batch = (T * N * (2 * 4 + 2 * compute_bytes)   # x, xn (f32) + xn/xn^T (compute)
                       + N * N * (4 + compute_bytes)         # adj f32 accumulate + stored copy
                       + 3 * fmax * N * 4                    # h, hw, agg (f32)
                       + 2 * fmax * N * compute_bytes        # matmul-operand casts
                       + 4 * N * 4                           # deg / d / row-sum temporaries
                       + layer_ops * compute_bytes)          # broadcast W^T copies
    per_batch = io_per_batch + inter_per_batch
    # >= 2 grid steps: input DMA of step g+1 hides under compute of step g, and
    # both TensorCores stay busy on v7x (2 TC/chip).
    max_block = max(1, B // 2)
    for cand in range(max_block, 0, -1):
        if B % cand == 0 and cand * per_batch <= budget_bytes:
            return cand
    return 1


def virtual_gcn_forward(flow, edge, params, *, batch_block=None,
                        precision="bf16", vmem_limit_bytes=None):
    """flow: (B, T, city, city); edge: (B, city, city, E);
    params: list of (W (in,out), b (out,)). Returns (B, city, city, out_dim)."""
    B, T, city, _ = flow.shape
    E = edge.shape[-1]
    N = city * city
    out_dim = params[-1][0].shape[1]
    feat_dims = [E] + [w.shape[1] for (w, _) in params]

    compute_dtype = jnp.bfloat16 if precision == "bf16" else jnp.float32
    in_dtype = compute_dtype            # halves the streamed HBM->VMEM DMAs in bf16 mode
    in_bytes = jnp.dtype(in_dtype).itemsize
    compute_bytes = jnp.dtype(compute_dtype).itemsize

    flow_k = flow.reshape(B, T, N).astype(in_dtype)                  # (B, T, N)
    # One-time wrapper-side relayout: features-on-sublanes / N-on-lanes input.
    edge_k = jnp.swapaxes(edge.reshape(B, N, E), 1, 2).astype(in_dtype)  # (B, E, N)

    if vmem_limit_bytes is None:
        vmem_limit_bytes = _default_vmem_limit_bytes()

    # Double-buffered weight/bias blocks are constant residents.
    weights_bytes = 2 * sum(w.size * compute_bytes + bias.size * 4
                            for (w, bias) in params)
    if batch_block is None:
        budget = (vmem_limit_bytes * 9) // 10 - weights_bytes
        batch_block = _pick_batch_block(B, T, N, E, feat_dims, out_dim,
                                        in_bytes, compute_bytes, budget)
    assert B % batch_block == 0
    grid = (B // batch_block,)

    in_specs = [
        pl.BlockSpec((batch_block, T, N), lambda g: (g, 0, 0)),
        pl.BlockSpec((batch_block, E, N), lambda g: (g, 0, 0)),
    ]
    args = [flow_k, edge_k]
    for (w, bias) in params:
        wt = jnp.asarray(w, jnp.float32).T                           # (Fout, Fin)
        in_specs.append(pl.BlockSpec(wt.shape, lambda g: (0, 0)))
        in_specs.append(pl.BlockSpec((wt.shape[0], 1), lambda g: (0, 0)))
        args.append(wt.astype(compute_dtype))
        args.append(jnp.asarray(bias, jnp.float32).reshape(-1, 1))   # (Fout, 1) f32

    out = pl.pallas_call(
        _make_kernel(compute_dtype),
        out_shape=jax.ShapeDtypeStruct((B, out_dim, N), jnp.float32),
        grid=grid,
        in_specs=in_specs,
        out_specs=pl.BlockSpec((batch_block, out_dim, N), lambda g: (g, 0, 0)),
        compiler_params=pltpu.CompilerParams(
            dimension_semantics=("parallel",),
            vmem_limit_bytes=int(vmem_limit_bytes)),
    )(*args)
    # (B, out_dim, N) -> (B, city, city, out_dim)
    return jnp.swapaxes(out, 1, 2).reshape(B, city, city, out_dim)


def _reference_forward(flow, edge, params):
    """Pure-JAX reference (f32, HIGHEST matmul precision) for validation."""
    B, T, city, _ = flow.shape
    E = edge.shape[-1]
    N = city * city
    x = flow.reshape(B, T, N).astype(jnp.float32)
    nrm = jnp.sqrt(jnp.sum(x * x, axis=2, keepdims=True))
    xn = x / jnp.maximum(nrm, 1e-12)
    adj = jnp.einsum('bti,btj->bij', xn, xn, precision='highest')
    deg = jnp.sum(adj, axis=1)
    dis = jnp.where(deg > 0, deg ** -0.5, 0.0)
    a_hat = dis[:, :, None] * adj * dis[:, None, :]
    h = edge.reshape(B, N, E).astype(jnp.float32)
    for (w, b) in params:
        hw = jnp.einsum('bnf,fg->bng', h, w, precision='highest')
        h = jnp.maximum(
            jnp.einsum('bij,bjf->bif', a_hat, hw, precision='highest')
            + b[None, None, :], 0.0)
    return h.reshape(B, city, city, -1)


def init_params(key, input_dim, hidden_list, output_dim):
    """Deterministic synthetic GCNConv params (glorot-ish W, small random b)."""
    dims = [input_dim] + list(hidden_list) + [output_dim]
    params = []
    for i in range(len(dims) - 1):
        key, kw, kb = jax.random.split(key, 3)
        fan_in, fan_out = dims[i], dims[i + 1]
        limit = (6.0 / (fan_in + fan_out)) ** 0.5
        w = jax.random.uniform(kw, (fan_in, fan_out), jnp.float32, -limit, limit)
        b = 0.01 * jax.random.normal(kb, (fan_out,), jnp.float32)
        params.append((w, b))
    return params


if __name__ == "__main__":
    # Small shapes consistent with the module's forward signature.
    batch, time, city, embedding = 2, 8, 4, 8
    hidden_list = [16, 32]
    output_dim = 8

    key = jax.random.PRNGKey(0)
    k_flow, k_edge, k_par = jax.random.split(key, 3)
    # Flow volumes are non-negative (keeps GCN degrees positive, the
    # well-defined regime of the reference; negative degrees NaN in torch too).
    flow = jax.random.uniform(k_flow, (batch, time, city, city), jnp.float32)
    edge = jax.random.normal(k_edge, (batch, city, city, embedding), jnp.float32)
    params = init_params(k_par, embedding, hidden_list, output_dim)

    ref = _reference_forward(flow, edge, params)

    # Default path: bf16 matmul operands, f32 accumulation / elementwise.
    out = jax.block_until_ready(virtual_gcn_forward(flow, edge, params))
    assert out.shape == (batch, city, city, output_dim)
    err_bf16 = float(jnp.max(jnp.abs(out - ref)))
    assert jnp.allclose(out, ref, rtol=2e-2, atol=2e-2), err_bf16

    # Full-f32 path: tighter structural check against the reference.
    out32 = jax.block_until_ready(
        virtual_gcn_forward(flow, edge, params, precision="f32"))
    err_f32 = float(jnp.max(jnp.abs(out32 - ref)))
    assert jnp.allclose(out32, ref, rtol=1e-2, atol=1e-2), err_f32

    print("KERNEL_OK")
</pallas_src>

<mosaic_0001>
module attributes {stable_mosaic.version = 11 : i64} {
  func.func @kernel(%arg0: i32, %arg1: memref<1x8x16xbf16, #tpu.memory_space<vmem>>, %arg2: memref<1x8x16xbf16, #tpu.memory_space<vmem>>, %arg3: memref<16x8xbf16, #tpu.memory_space<vmem>>, %arg4: memref<16x1xf32, #tpu.memory_space<vmem>>, %arg5: memref<32x16xbf16, #tpu.memory_space<vmem>>, %arg6: memref<32x1xf32, #tpu.memory_space<vmem>>, %arg7: memref<8x32xbf16, #tpu.memory_space<vmem>>, %arg8: memref<8x1xf32, #tpu.memory_space<vmem>>, %arg9: memref<1x8x16xf32, #tpu.memory_space<vmem>>) attributes {dimension_semantics = [#tpu.dimension_semantics<parallel>], iteration_bounds = array<i64: 2>, scalar_prefetch = 0 : i64, scratch_operands = 0 : i64, tpu.core_type = #tpu.core_type<tc>, window_params = [{transform_indices = @transform_0, window_bounds = array<i64: 1, 8, 16>}, {transform_indices = @transform_1, window_bounds = array<i64: 1, 8, 16>}, {pipeline_mode = #tpu.pipeline_mode<synchronous>, transform_indices = @transform_2, window_bounds = array<i64: 16, 8>}, {pipeline_mode = #tpu.pipeline_mode<synchronous>, transform_indices = @transform_3, window_bounds = array<i64: 16, 1>}, {pipeline_mode = #tpu.pipeline_mode<synchronous>, transform_indices = @transform_4, window_bounds = array<i64: 32, 16>}, {pipeline_mode = #tpu.pipeline_mode<synchronous>, transform_indices = @transform_5, window_bounds = array<i64: 32, 1>}, {pipeline_mode = #tpu.pipeline_mode<synchronous>, transform_indices = @transform_6, window_bounds = array<i64: 8, 32>}, {pipeline_mode = #tpu.pipeline_mode<synchronous>, transform_indices = @transform_7, window_bounds = array<i64: 8, 1>}, {transform_indices = @transform_8, window_bounds = array<i64: 1, 8, 16>}]} {
    %c0 = arith.constant 0 : index
    %c0_0 = arith.constant 0 : index
    %c0_1 = arith.constant 0 : index
    %0 = vector.load %arg1[%c0, %c0_0, %c0_1] : memref<1x8x16xbf16, #tpu.memory_space<vmem>>, vector<1x8x16xbf16>
    %1 = arith.extf %0 : vector<1x8x16xbf16> to vector<1x8x16xf32>
    %2 = arith.mulf %1, %1 : vector<1x8x16xf32>
    %cst = arith.constant dense<0.000000e+00> : vector<1x8xf32>
    %3 = vector.multi_reduction <add>, %2, %cst [2] : vector<1x8x16xf32> to vector<1x8xf32>
    %4 = vector.shape_cast %3 : vector<1x8xf32> to vector<1x8x1xf32>
    %cst_2 = arith.constant 1.000000e-24 : f32
    %5 = vector.broadcast %cst_2 : f32 to vector<1x8x1xf32>
    %6 = arith.maximumf %4, %5 : vector<1x8x1xf32>
    %7 = math.rsqrt %6 : vector<1x8x1xf32>
    %8 = vector.broadcast %7 : vector<1x8x1xf32> to vector<1x8x16xf32>
    %9 = arith.mulf %1, %8 : vector<1x8x16xf32>
    %cst_3 = arith.constant dense<0.000000e+00> : vector<1x8xf32>
    %10 = vector.multi_reduction <add>, %9, %cst_3 [2] : vector<1x8x16xf32> to vector<1x8xf32>
    %11 = vector.shape_cast %10 : vector<1x8xf32> to vector<1x8x1xf32>
    %12 = vector.broadcast %11 : vector<1x8x1xf32> to vector<1x8x16xf32>
    %13 = arith.mulf %12, %9 : vector<1x8x16xf32>
    %cst_4 = arith.constant dense<0.000000e+00> : vector<1x16xf32>
    %14 = vector.multi_reduction <add>, %13, %cst_4 [1] : vector<1x8x16xf32> to vector<1x16xf32>
    %cst_5 = arith.constant 0.000000e+00 : f32
    %15 = vector.broadcast %cst_5 : f32 to vector<1x16xf32>
    %16 = arith.cmpf ogt, %14, %15 : vector<1x16xf32>
    %17 = math.rsqrt %14 : vector<1x16xf32>
    %cst_6 = arith.constant 0.000000e+00 : f32
    %18 = vector.broadcast %cst_6 : f32 to vector<1x16xf32>
    %19 = arith.select %16, %17, %18 : vector<1x16xi1>, vector<1x16xf32>
    %20 = vector.shape_cast %19 : vector<1x16xf32> to vector<1x1x16xf32>
    %21 = arith.truncf %9 : vector<1x8x16xf32> to vector<1x8x16xbf16>
    %22 = tpu.transpose %21, [0, 2, 1] : vector<1x8x16xbf16> -> vector<1x16x8xbf16>
    "tpu.trace_start"() <{level = 10 : i32, message = "bit,bjt->bij"}> : () -> ()
    %cst_7 = arith.constant dense<0.000000e+00> : vector<1x16x16xf32>
    %23 = tpu.matmul %22, %22, %cst_7 {dimension_numbers = #tpu.dot_dimension_numbers<[2], [2], [1], [1], [0, 0, 0, 1, 1, 1], [0], [0]>} : vector<1x16x8xbf16>, vector<1x16x8xbf16>, vector<1x16x16xf32> -> vector<1x16x16xf32>
    "tpu.trace_stop"() : () -> ()
    %24 = arith.truncf %23 : vector<1x16x16xf32> to vector<1x16x16xbf16>
    %c0_8 = arith.constant 0 : index
    %c0_9 = arith.constant 0 : index
    %c0_10 = arith.constant 0 : index
    %25 = vector.load %arg2[%c0_8, %c0_9, %c0_10] : memref<1x8x16xbf16, #tpu.memory_space<vmem>>, vector<1x8x16xbf16>
    %c0_11 = arith.constant 0 : index
    %c0_12 = arith.constant 0 : index
    %26 = vector.load %arg3[%c0_11, %c0_12] : memref<16x8xbf16, #tpu.memory_space<vmem>>, vector<16x8xbf16>
    %c0_13 = arith.constant 0 : index
    %c0_14 = arith.constant 0 : index
    %27 = vector.load %arg4[%c0_13, %c0_14] : memref<16x1xf32, #tpu.memory_space<vmem>>, vector<16x1xf32>
    %28 = vector.shape_cast %26 : vector<16x8xbf16> to vector<1x16x8xbf16>
    "tpu.trace_start"() <{level = 10 : i32, message = "bgf,bfn->bgn"}> : () -> ()
    %cst_15 = arith.constant dense<0.000000e+00> : vector<1x16x16xf32>
    %29 = tpu.matmul %28, %25, %cst_15 {dimension_numbers = #tpu.dot_dimension_numbers<[2], [1], [1], [2], [0, 0, 0, 1, 1, 2], [0], [0]>} : vector<1x16x8xbf16>, vector<1x8x16xbf16>, vector<1x16x16xf32> -> vector<1x16x16xf32>
    "tpu.trace_stop"() : () -> ()
    %30 = vector.broadcast %20 : vector<1x1x16xf32> to vector<1x16x16xf32>
    %31 = arith.mulf %29, %30 : vector<1x16x16xf32>
    %32 = arith.truncf %31 : vector<1x16x16xf32> to vector<1x16x16xbf16>
    "tpu.trace_start"() <{level = 10 : i32, message = "bgn,bnm->bgm"}> : () -> ()
    %cst_16 = arith.constant dense<0.000000e+00> : vector<1x16x16xf32>
    %33 = tpu.matmul %32, %24, %cst_16 {dimension_numbers = #tpu.dot_dimension_numbers<[2], [1], [1], [2], [0, 0, 0, 1, 1, 2], [0], [0]>} : vector<1x16x16xbf16>, vector<1x16x16xbf16>, vector<1x16x16xf32> -> vector<1x16x16xf32>
    "tpu.trace_stop"() : () -> ()
    %34 = vector.broadcast %20 : vector<1x1x16xf32> to vector<1x16x16xf32>
    %35 = arith.mulf %33, %34 : vector<1x16x16xf32>
    %36 = vector.shape_cast %27 : vector<16x1xf32> to vector<1x16x1xf32>
    %37 = vector.broadcast %36 : vector<1x16x1xf32> to vector<1x16x16xf32>
    %38 = arith.addf %35, %37 : vector<1x16x16xf32>
    %cst_17 = arith.constant 0.000000e+00 : f32
    %39 = vector.broadcast %cst_17 : f32 to vector<1x16x16xf32>
    %40 = arith.maximumf %38, %39 : vector<1x16x16xf32>
    %c0_18 = arith.constant 0 : index
    %c0_19 = arith.constant 0 : index
    %41 = vector.load %arg5[%c0_18, %c0_19] : memref<32x16xbf16, #tpu.memory_space<vmem>>, vector<32x16xbf16>
    %c0_20 = arith.constant 0 : index
    %c0_21 = arith.constant 0 : index
    %42 = vector.load %arg6[%c0_20, %c0_21] : memref<32x1xf32, #tpu.memory_space<vmem>>, vector<32x1xf32>
    %43 = vector.shape_cast %41 : vector<32x16xbf16> to vector<1x32x16xbf16>
    %44 = arith.truncf %40 : vector<1x16x16xf32> to vector<1x16x16xbf16>
    "tpu.trace_start"() <{level = 10 : i32, message = "bgf,bfn->bgn"}> : () -> ()
    %cst_22 = arith.constant dense<0.000000e+00> : vector<1x32x16xf32>
    %45 = tpu.matmul %43, %44, %cst_22 {dimension_numbers = #tpu.dot_dimension_numbers<[2], [1], [1], [2], [0, 0, 0, 1, 1, 2], [0], [0]>} : vector<1x32x16xbf16>, vector<1x16x16xbf16>, vector<1x32x16xf32> -> vector<1x32x16xf32>
    "tpu.trace_stop"() : () -> ()
    %46 = vector.broadcast %20 : vector<1x1x16xf32> to vector<1x32x16xf32>
    %47 = arith.mulf %45, %46 : vector<1x32x16xf32>
    %48 = arith.truncf %47 : vector<1x32x16xf32> to vector<1x32x16xbf16>
    "tpu.trace_start"() <{level = 10 : i32, message = "bgn,bnm->bgm"}> : () -> ()
    %cst_23 = arith.constant dense<0.000000e+00> : vector<1x32x16xf32>
    %49 = tpu.matmul %48, %24, %cst_23 {dimension_numbers = #tpu.dot_dimension_numbers<[2], [1], [1], [2], [0, 0, 0, 1, 1, 2], [0], [0]>} : vector<1x32x16xbf16>, vector<1x16x16xbf16>, vector<1x32x16xf32> -> vector<1x32x16xf32>
    "tpu.trace_stop"() : () -> ()
    %50 = vector.broadcast %20 : vector<1x1x16xf32> to vector<1x32x16xf32>
    %51 = arith.mulf %49, %50 : vector<1x32x16xf32>
    %52 = vector.shape_cast %42 : vector<32x1xf32> to vector<1x32x1xf32>
    %53 = vector.broadcast %52 : vector<1x32x1xf32> to vector<1x32x16xf32>
    %54 = arith.addf %51, %53 : vector<1x32x16xf32>
    %cst_24 = arith.constant 0.000000e+00 : f32
    %55 = vector.broadcast %cst_24 : f32 to vector<1x32x16xf32>
    %56 = arith.maximumf %54, %55 : vector<1x32x16xf32>
    %c0_25 = arith.constant 0 : index
    %c0_26 = arith.constant 0 : index
    %57 = vector.load %arg7[%c0_25, %c0_26] : memref<8x32xbf16, #tpu.memory_space<vmem>>, vector<8x32xbf16>
    %c0_27 = arith.constant 0 : index
    %c0_28 = arith.constant 0 : index
    %58 = vector.load %arg8[%c0_27, %c0_28] : memref<8x1xf32, #tpu.memory_space<vmem>>, vector<8x1xf32>
    %59 = vector.shape_cast %57 : vector<8x32xbf16> to vector<1x8x32xbf16>
    %60 = arith.truncf %56 : vector<1x32x16xf32> to vector<1x32x16xbf16>
    "tpu.trace_start"() <{level = 10 : i32, message = "bgf,bfn->bgn"}> : () -> ()
    %cst_29 = arith.constant dense<0.000000e+00> : vector<1x8x16xf32>
    %61 = tpu.matmul %59, %60, %cst_29 {dimension_numbers = #tpu.dot_dimension_numbers<[2], [1], [1], [2], [0, 0, 0, 1, 1, 2], [0], [0]>} : vector<1x8x32xbf16>, vector<1x32x16xbf16>, vector<1x8x16xf32> -> vector<1x8x16xf32>
    "tpu.trace_stop"() : () -> ()
    %62 = vector.broadcast %20 : vector<1x1x16xf32> to vector<1x8x16xf32>
    %63 = arith.mulf %61, %62 : vector<1x8x16xf32>
    %64 = arith.truncf %63 : vector<1x8x16xf32> to vector<1x8x16xbf16>
    "tpu.trace_start"() <{level = 10 : i32, message = "bgn,bnm->bgm"}> : () -> ()
    %cst_30 = arith.constant dense<0.000000e+00> : vector<1x8x16xf32>
    %65 = tpu.matmul %64, %24, %cst_30 {dimension_numbers = #tpu.dot_dimension_numbers<[2], [1], [1], [2], [0, 0, 0, 1, 1, 2], [0], [0]>} : vector<1x8x16xbf16>, vector<1x16x16xbf16>, vector<1x8x16xf32> -> vector<1x8x16xf32>
    "tpu.trace_stop"() : () -> ()
    %66 = vector.broadcast %20 : vector<1x1x16xf32> to vector<1x8x16xf32>
    %67 = arith.mulf %65, %66 : vector<1x8x16xf32>
    %68 = vector.shape_cast %58 : vector<8x1xf32> to vector<1x8x1xf32>
    %69 = vector.broadcast %68 : vector<1x8x1xf32> to vector<1x8x16xf32>
    %70 = arith.addf %67, %69 : vector<1x8x16xf32>
    %cst_31 = arith.constant 0.000000e+00 : f32
    %71 = vector.broadcast %cst_31 : f32 to vector<1x8x16xf32>
    %72 = arith.maximumf %70, %71 : vector<1x8x16xf32>
    %c0_32 = arith.constant 0 : index
    %c0_33 = arith.constant 0 : index
    %c0_34 = arith.constant 0 : index
    %73 = vector.load %arg9[%c0_32, %c0_33, %c0_34] : memref<1x8x16xf32, #tpu.memory_space<vmem>>, vector<1x8x16xf32>
    tpu.vector_store %arg9[%c0_32, %c0_33, %c0_34], %72 {strides = array<i32>} : memref<1x8x16xf32, #tpu.memory_space<vmem>>, vector<1x8x16xf32>,
    return
  }
  func.func @transform_0(%arg0: i32) -> (i32, i32, i32) {
    %c0_i32 = arith.constant 0 : i32
    %c0_i32_0 = arith.constant 0 : i32
    %c0_i32_1 = arith.constant 0 : i32
    return %arg0, %c0_i32, %c0_i32_0 : i32, i32, i32
  }
  func.func @transform_1(%arg0: i32) -> (i32, i32, i32) {
    %c0_i32 = arith.constant 0 : i32
    %c0_i32_0 = arith.constant 0 : i32
    %c0_i32_1 = arith.constant 0 : i32
    return %arg0, %c0_i32, %c0_i32_0 : i32, i32, i32
  }
  func.func @transform_2(%arg0: i32) -> (i32, i32) {
    %c0_i32 = arith.constant 0 : i32
    %c0_i32_0 = arith.constant 0 : i32
    %c0_i32_1 = arith.constant 0 : i32
    return %c0_i32, %c0_i32_0 : i32, i32
  }
  func.func @transform_3(%arg0: i32) -> (i32, i32) {
    %c0_i32 = arith.constant 0 : i32
    %c0_i32_0 = arith.constant 0 : i32
    %c0_i32_1 = arith.constant 0 : i32
    return %c0_i32, %c0_i32_0 : i32, i32
  }
  func.func @transform_4(%arg0: i32) -> (i32, i32) {
    %c0_i32 = arith.constant 0 : i32
    %c0_i32_0 = arith.constant 0 : i32
    %c0_i32_1 = arith.constant 0 : i32
    return %c0_i32, %c0_i32_0 : i32, i32
  }
  func.func @transform_5(%arg0: i32) -> (i32, i32) {
    %c0_i32 = arith.constant 0 : i32
    %c0_i32_0 = arith.constant 0 : i32
    %c0_i32_1 = arith.constant 0 : i32
    return %c0_i32, %c0_i32_0 : i32, i32
  }
  func.func @transform_6(%arg0: i32) -> (i32, i32) {
    %c0_i32 = arith.constant 0 : i32
    %c0_i32_0 = arith.constant 0 : i32
    %c0_i32_1 = arith.constant 0 : i32
    return %c0_i32, %c0_i32_0 : i32, i32
  }
  func.func @transform_7(%arg0: i32) -> (i32, i32) {
    %c0_i32 = arith.constant 0 : i32
    %c0_i32_0 = arith.constant 0 : i32
    %c0_i32_1 = arith.constant 0 : i32
    return %c0_i32, %c0_i32_0 : i32, i32
  }
  func.func @transform_8(%arg0: i32) -> (i32, i32, i32) {
    %c0_i32 = arith.constant 0 : i32
    %c0_i32_0 = arith.constant 0 : i32
    %c0_i32_1 = arith.constant 0 : i32
    return %arg0, %c0_i32, %c0_i32_0 : i32, i32, i32
  }
}

</mosaic_0001>

<bundles_post_ra>
// kernel: tpu_custom_call.1
= control target key start
LH: loop header
LB: loop body
LE: loop exit
PB: predicated region body
PF: predicated region fallthrough
CT: control target
= control target key end

     0   :  { %13 = vsyncpa [#allocation3], 0  ;;  %s1094_s0 = inlined_call_operand.vmem [shape: bf16[2,8,16], index: 0, kind: input, shape index: {}]   ;;  %s1095_s1 = inlined_call_operand.vmem [shape: bf16[2,8,16], index: 1, kind: input, shape index: {}]   ;;  %s1096_s2 = inlined_call_operand.vmem [shape: bf16[16,8], index: 2, kind: input, shape index: {}]   ;;  %s1097_s3 = inlined_call_operand.vmem [shape: f32[16,1], index: 3, kind: input, shape index: {}]   ;;  %s1098_s4 = inlined_call_operand.vmem [shape: bf16[32,16], index: 4, kind: input, shape index: {}]   ;;  %s1099_s5 = inlined_call_operand.vmem [shape: f32[32,1], index: 5, kind: input, shape index: {}]   ;;  %s1100_s6 = inlined_call_operand.vmem [shape: bf16[8,32], index: 6, kind: input, shape index: {}]   ;;  %s1101_s7 = inlined_call_operand.vmem [shape: f32[8,1], index: 7, kind: input, shape index: {}]   ;;  %s1102_s8 = inlined_call_operand.hbm [shape: f32[2,8,16], index: 8, kind: output, shape index: {}]  }
   0x1   :  { %15 = vsyncpa [#allocation3 + $0x1], 0  ;;  %s944_s27 = smov 0   ;;  %s946_s28 = smov 0  }
   0x2   :  { %s948_s29 = smov 0   ;;  %s950_s30 = smov 0  }
   0x3 LB: > { %s965_s9 = sadd.s32 4294967295, %s896_s30   ;;  %s752_s10 = sadd.s32 4294967294, %s896_s30   ;;  %s896_s30 = sphi %s950_s30, %s1108_s30   ;;  %s892_s29 = sphi %s948_s29, %s1107_s29   ;;  %s888_s28 = sphi %s946_s28, %s1106_s28   ;;  %s884_s27 = sphi %s944_s27, %s1105_s27  }
   0x4   : > { %s969_s11 = sadd.s32 1, %s896_s30   ;;  %s206_s12 = sadd.s32 1, %s892_s29 }
   0x5   : > { %s203_s13 = ssub.s32 %s896_s30, %s969_s11  ;;  %p216_p0 = scmp.ne.s32.totalorder %s892_s29, %s888_s28 }
   0x6   : > { %p204_p1 = scmp.eq.s32.totalorder %s203_s13, 0  ;;  %p217_p2 = scmp.eq.s32.totalorder %s965_s9, 1 }
   0x7   : > { %p222_p3 = scmp.ne.s32.totalorder %s888_s28, %s884_s27  ;;  %p223_p4 = scmp.eq.s32.totalorder %s752_s10, 1 }
   0x8   : > { %s980_s14 = scalar_select %p204_p1, %s892_s29, %s206_s12  }
   0x9   : > { %p982_p5 = por %p217_p2, %p216_p0  ;;  %p986_p6 = por %p223_p4, %p222_p3 }
   0xa   : > { %p755_p7 = scmp.ge.s32.totalorder %s896_s30, 1  ;;  %p273_p8 = scmp.lt.s32.totalorder %s896_s30, 3 }
   0xc   : > { %p274_p9 = pnand %p755_p7, %p273_p8 }
   0xd   : > { %p310_p10 = scmp.lt.s32.totalorder (!%p274_p9), %s965_s9, 1  ;;  %s781_s23 = sshll.u32 (!%p274_p9), %s965_s9, 3 }
   0xe   : > { %277 = sbr.rel (%p274_p9) target bundleno = 1237 (0x4d5), region = 52  ;;  %s676_s26 = scalar_lea.hbm (!%p274_p9), %s1102_s8, %s781_s23 }
   0xf   : > { %s680_s13 = sshll.u32 (!%p274_p9), %s676_s26, 4  ;;  %s681_s13 = int_to_ptr.hbm [resolvable:$true] %s680_s13 }
  0x13   : > { %s311_s17 = scalar_select %p310_p10, %s965_s9, 1  ;;  %vm322_vm0 = vcmask 130048   ;;  %vm411_vm1 = vcmask 1043456   ;;  %v784_v6 = vld [vmem:[%s1096_s2] sm:$0xff]  ;;  %vm378_vm2 = vcmask 64512   ;;  %v402_v34 = vld [vmem:[%s1097_s3 + $0x8] sm:$0xff] }
  0x14   : > { %v401_v35 = vld [vmem:[%s1097_s3] sm:$0xff]  ;;  %v898_v36 = vmov 0   ;;  %v483_v39 = vld [vmem:[%s1099_s5 + $0x10] sm:$0xff]  ;;  %v484_v46 = vld [vmem:[%s1099_s5 + $0x18] sm:$0xff]  ;;  %vm621_vm10 = vcmask 261120  }
  0x15   : > { %s757_s18 = sshll.u32 %s311_s17, 2  ;;  %828 = vset.pattern.permute.xlu2 %v898_v36  ;;  %827 = vset.pattern.permute.xlu1 %v898_v36  ;;  %v604_v40 = vld [vmem:[%s1101_s7] sm:$0xff]  ;;  %v482_v61 = vld [vmem:[%s1099_s5 + $0x8] sm:$0xff]  ;;  %s848_s17 = sshra.s32 %s681_s13, 4  ;;  %s849_s17 = int_to_ptr.hbm [resolvable:$true] %s848_s17 }
  0x16   : > { %s313_s21 = scalar_lea.vmem %s1094_s0, %s757_s18  ;;  %s317_s24 = scalar_lea.vmem %s1095_s1, %s757_s18  ;;  %470 = vperm.xlu2 %828, %v402_v34   ;;  %v481_v54 = vld [vmem:[%s1099_s5] sm:$0xff] }
  0x17   : > { %v319_v0 = vld [vmem:[%s313_s21] sm:$0xf]  ;;  %s307_s21 = sand.u32 1, %s888_s28   ;;  %s850_s18 = scalar_lea.hbm %s849_s17, 8 }
  0x18   : > { %v320_v1 = vunpack.c.l.bf16 %v319_v0  ;;  %v398_v4 = vld [vmem:[%s317_s24] sm:$0xf]  ;;  %s756_s22 = sshll.u32 %s307_s21, 3  ;;  %s666_s9 = scalar_lea.sflag [#allocation3], %s307_s21 }
  0x19   : > { %v413_v5 = vsel %vm411_vm1, %v398_v4, 0  ;;  %s309_s10 = scalar_lea.vmem [#allocation2], %s756_s22  ;;  %p851_p11 = scmp.ne.s32.totalorder %s849_s17, %s850_s18 }
  0x1a   : > { %v321_v2 = vmul.f32 %v320_v1, %v320_v1  ;;  %422 = vmatpush.bf16.msra.mxu1 %v413_v5  ;;  %s678_s12 = sshll.u32 %s309_s10, 4  ;;  %s854_s22 = scalar_lea.hbm %s1102_s8, 16  ;;  %s679_s12 = int_to_ptr.vmem [resolvable:$true] %s678_s12 }
  0x1b   : > { %p852_p12 = pnand %p851_p11, %p982_p5  ;;  %p855_p0 = scmp.lt.s32.totalorder %s849_s17, %s1102_s8 }
  0x1c   : > { %v323_v3 = vsel %vm322_vm0, %v321_v2, 0.0  ;;  %p856_p1 = scmp.lt.s32.totalorder %s854_s22, %s850_s18 }
  0x1d   : > { %324 = vadd.xlane.f32.xlu0 %v323_v3  ;;  %764 = vmatmul.msk.bf16.vlgmr.msra.gmra.mxu1 %vm378_vm2, %v784_v6  ;;  %p853_p13 = pneg %p852_p12 }
  0x1e   : > { %587 = vperm.xlu2 %828, %v483_v39   ;;  %p857_p2 = por %p856_p1, %p855_p0 }
  0x20   : > { %p858_p3 = pnand %p857_p2, %p853_p13 }
  0x26   : > { %592 = vperm.xlu2 %828, %v484_v46  }
  0x2e   : > { %577 = vperm.xlu2 %828, %v481_v54  }
  0x36   : > { %582 = vperm.xlu2 %828, %v482_v61  }
  0x70   : > { %v471_v5 = vpop.permute.xlu2 %470 }
  0x90   : > { %v325_v7 = vpop.xlane.xlu0 %324 }
  0x91   : > { %v326_v8 = vmax.f32 %v325_v7, 1e-24 }
  0x93   : > { %830 = vrsqrt.f32 %v326_v8  ;;  %vm333_vm4 = vweird.f32 %v326_v8 }
  0x99   : > { %v831_v9 = vpop.eup %830 }
  0x9a   : > { %v328_v10 = vmul.f32 %v831_v9, %v326_v8  ;;  %vm334_vm3 = vweird.f32 %v831_v9  ;;  %v424_v38 = vpop.f32.mrf.mxu1 }
  0x9b   : > { %vm335_vm5 = vmor %vm333_vm4, %vm334_vm3 }
  0x9c   : > { %v329_v11 = vmul.f32 %v831_v9, %v328_v10 }
  0x9e   : > { %v330_v12 = vmul.f32 0.5, %v329_v11 }
  0xa0   : > { %v331_v13 = vsub.f32 1.5, %v330_v12 }
  0xa2   : > { %v332_v14 = vmul.f32 %v831_v9, %v331_v13  ;;  %v426_v45 = vpop.f32.mrf.mxu1  ;;  %v785_v13 = vld [vmem:[%s1098_s4] sm:$0xff] }
  0xa4   : > { %v336_v15 = vsel %vm335_vm5, %v831_v9, %v332_v14  ;;  %v786_v14 = vld [vmem:[%s1098_s4 + $0x8] sm:$0xff] }
  0xa5   : > { %v337_v16 = vmul.f32 %v336_v15, %v320_v1 }
  0xa7   : > { %v338_v17 = vsel %vm322_vm0, %v337_v16, 0.0  ;;  %v361_v18 = vpack.c.bf16 %v337_v16, %v337_v16 }
  0xa8   : > { %339 = vadd.xlane.f32.xlu1 %v338_v17 }
  0xa9   : > { %362 = vxpose.xlu0.c.b16.start.end [1/1] (short) (narrow) %v361_v18, 16 }
  0xc1   : > { %465 = vperm.xlu1 %827, %v401_v35  }
  0xc9   : > { %659 = vperm.xlu1 %827, %v604_v40  }
 0x110   : > { %829 = vset.pattern.permute.xlu0 %v898_v36 }
 0x11b   : > { %v340_v21 = vpop.xlane.xlu1 %339 }
 0x11c   : > { %v341_v22 = vmul.f32 %v340_v21, %v337_v16 }
 0x11e   : > { %v342_v23 = vsel %vm322_vm0, %v341_v22, 0.0 }
 0x11f   : > { %v343_v24 = vrot.slane %v342_v23, 4 }
 0x121   : > { %v344_v25 = vadd.f32 %v343_v24, %v342_v23 }
 0x123   : > { %v345_v26 = vrot.slane %v344_v25, 2 }
 0x125   : > { %v346_v27 = vadd.f32 %v345_v26, %v344_v25 }
 0x127   : > { %v347_v28 = vrot.slane %v346_v27, 1 }
 0x129   : > { %v348_v29 = vadd.f32 %v347_v28, %v346_v27 }
 0x12b   : > { %832 = vrsqrt.f32 %v348_v29  ;;  %vm356_vm7 = vweird.f32 %v348_v29  ;;  %vm349_vm9 = vcmp.gt.f32.partialorder %v348_v29, 0.0 }
 0x131   : > { %v833_v30 = vpop.eup %832 }
 0x132   : > { %v351_v31 = vmul.f32 %v833_v30, %v348_v29  ;;  %vm357_vm6 = vweird.f32 %v833_v30 }
 0x133   : > { %vm358_vm8 = vmor %vm356_vm7, %vm357_vm6  ;;  %v466_v0 = vpop.permute.xlu1 %465 }
 0x134   : > { %v352_v32 = vmul.f32 %v833_v30, %v351_v31 }
 0x136   : > { %v353_v33 = vmul.f32 0.5, %v352_v32 }
 0x138   : > { %v354_v37 = vsub.f32 1.5, %v353_v33  ;;  %v588_v33 = vpop.permute.xlu2 %587 }
 0x13a   : > { %v355_v41 = vmul.f32 %v833_v30, %v354_v37 }
 0x13c   : > { %v359_v42 = vsel %vm358_vm8, %v833_v30, %v355_v41 }
 0x13d   : > { %v1021_v44 = vsel %vm349_vm9, %v359_v42, 0.0 }
 0x13e   : > { %v429_v47 = vmul.f32 %v424_v38, %v1021_v44  ;;  %v430_v48 = vmul.f32 %v426_v45, %v1021_v44 }
 0x140   : > { %v431_v50 = vpack.c.bf16 %v429_v47, %v429_v47  ;;  %v432_v51 = vpack.c.bf16 %v430_v48, %v430_v48  ;;  %v593_v35 = vpop.permute.xlu2 %592 }
 0x142   : > { %v435_v57 = vunpack.c.l.b16 %v431_v50  ;;  %v436_v58 = vunpack.c.l.b16 %v432_v51 }
 0x144   : > { %v437_v60 = vpack.c.b16 %v436_v58, %v435_v57 }
 0x148   : > { %v578_v37 = vpop.permute.xlu2 %577 }
 0x155   : > { %v370_v19 = vpop.trf.xlu0 }
 0x156   : > { %v380_v20 = vsel %vm378_vm2, %v370_v19, 0 }
 0x157   : > { %389 = vmatpush.bf16.xpose.msra.mxu0 %v380_v20 }
 0x15e   : > { %759 = vmatmul.msk.bf16.vlgmr.msra.gmra.mxu0 %vm378_vm2, %v370_v19 }
 0x1db   : > { %v391_v43 = vpop.f32.mrf.mxu0 }
 0x1dc   : > { %v396_v49 = vpack.c.bf16 %v391_v43, %v391_v43  ;;  %v583_v43 = vpop.permute.xlu2 %582 }
 0x1de   : > { %v440_v55 = vunpack.c.l.b16 %v396_v49 }
 0x1e3   : > { %v393_v52 = vpop.f32.mrf.mxu0 }
 0x1e4   : > { %v397_v53 = vpack.c.bf16 %v393_v52, %v393_v52 }
 0x1e6   : > { %v441_v56 = vunpack.c.l.b16 %v397_v53 }
 0x1e8   : > { %v442_v59 = vpack.c.b16 %v441_v56, %v440_v55 }
 0x1ea   : > { %454 = vmatpush.bf16.msra.mxu2 %v442_v59  ;;  %559 = vmatpush.bf16.msrb.mxu1 %v442_v59 }
 0x1eb   : > { %650 = vmatpush.bf16.msrb.mxu0 %v442_v59 }
 0x1ed   : > { %765 = vmatmul.msk.bf16.vlgmr.msra.gmra.mxu2 %vm322_vm0, %v437_v60 }
 0x270   : > { %v456_v62 = vpop.f32.mrf.mxu2 }
 0x271   : > { %v461_v63 = vmul.f32 %v456_v62, %v1021_v44 }
 0x273   : > { %v473_v1 = vadd.f32 %v466_v0, %v461_v63  ;;  %v603_v0 = vld [vmem:[%s1100_s6] sm:$0xf] }
 0x275   : > { %v475_v3 = vmax.f32 %v473_v1, 0.0 }
 0x277   : > { %v485_v7 = vpack.c.bf16 %v475_v3, %v475_v3 }
 0x278   : > { %v458_v2 = vpop.f32.mrf.mxu2 }
 0x279   : > { %v462_v4 = vmul.f32 %v458_v2, %v1021_v44  ;;  %v499_v10 = vunpack.c.l.b16 %v485_v7  ;;  %v660_v7 = vpop.permute.xlu1 %659 }
 0x27b   : > { %v474_v6 = vadd.f32 %v471_v5, %v462_v4 }
 0x27d   : > { %v476_v8 = vmax.f32 %v474_v6, 0.0 }
 0x27f   : > { %v486_v9 = vpack.c.bf16 %v476_v8, %v476_v8 }
 0x281   : > { %v500_v11 = vunpack.c.l.b16 %v486_v9 }
 0x283   : > { %v501_v12 = vpack.c.b16 %v500_v11, %v499_v10 }
 0x285   : > { %516 = vmatpush.bf16.msra.mxu3 %v501_v12 }
 0x288   : > { %774 = vmatmul.msk.bf16.vlgmr.msra.gmra.mxu3 %vm322_vm0, %v785_v13 }
 0x298   : > { %775 = vmatmul.msk.bf16.gmra.mxu3 %vm322_vm0, %v786_v14 }
 0x30b   : > { %v518_v15 = vpop.f32.mrf.mxu3 }
 0x30c   : > { %v528_v16 = vmul.f32 %v518_v15, %v1021_v44 }
 0x30e   : > { %v532_v18 = vpack.c.bf16 %v528_v16, %v528_v16 }
 0x310   : > { %v540_v21 = vunpack.c.l.b16 %v532_v18 }
 0x313   : > { %v520_v17 = vpop.f32.mrf.mxu3 }
 0x314   : > { %v529_v19 = vmul.f32 %v520_v17, %v1021_v44 }
 0x316   : > { %v533_v20 = vpack.c.bf16 %v529_v19, %v529_v19 }
 0x318   : > { %v541_v22 = vunpack.c.l.b16 %v533_v20 }
 0x31a   : > { %v544_v23 = vpack.c.b16 %v541_v22, %v540_v21 }
 0x31b   : > { %v523_v24 = vpop.f32.mrf.mxu3 }
 0x31c   : > { %776 = vmatmul.msk.bf16.vlgmr.msrb.gmra.mxu1 %vm322_vm0, %v544_v23  ;;  %v530_v25 = vmul.f32 %v523_v24, %v1021_v44 }
 0x31e   : > { %v534_v27 = vpack.c.bf16 %v530_v25, %v530_v25 }
 0x320   : > { %v542_v30 = vunpack.c.l.b16 %v534_v27 }
 0x323   : > { %v525_v26 = vpop.f32.mrf.mxu3 }
 0x324   : > { %v531_v28 = vmul.f32 %v525_v26, %v1021_v44 }
 0x326   : > { %v535_v29 = vpack.c.bf16 %v531_v28, %v531_v28 }
 0x328   : > { %v543_v31 = vunpack.c.l.b16 %v535_v29 }
 0x32a   : > { %v545_v32 = vpack.c.b16 %v543_v31, %v542_v30 }
 0x32c   : > { %777 = vmatmul.msk.bf16.gmra.mxu1 %vm322_vm0, %v545_v32 }
 0x399   : > { %v561_v34 = vpop.f32.mrf.mxu1 }
 0x39a   : > { %v571_v41 = vmul.f32 %v561_v34, %v1021_v44 }
 0x39c   : > { %v595_v47 = vadd.f32 %v578_v37, %v571_v41 }
 0x39e   : > { %v599_v52 = vmax.f32 %v595_v47, 0.0 }
 0x3a0   : > { %v605_v57 = vpack.c.bf16 %v599_v52, %v599_v52 }
 0x3a1   : > { %v563_v36 = vpop.f32.mrf.mxu1 }
 0x3a2   : > { %v572_v40 = vmul.f32 %v563_v36, %v1021_v44  ;;  %v613_v62 = vunpack.c.l.b16 %v605_v57 }
 0x3a4   : > { %v596_v45 = vadd.f32 %v583_v43, %v572_v40 }
 0x3a6   : > { %v600_v50 = vmax.f32 %v596_v45, 0.0 }
 0x3a8   : > { %v606_v55 = vpack.c.bf16 %v600_v50, %v600_v50 }
 0x3a9   : > { %v566_v38 = vpop.f32.mrf.mxu1 }
 0x3aa   : > { %v573_v39 = vmul.f32 %v566_v38, %v1021_v44  ;;  %v614_v61 = vunpack.c.l.b16 %v606_v55 }
 0x3ac   : > { %v597_v42 = vadd.f32 %v588_v33, %v573_v39  ;;  %v617_v63 = vpack.c.b16 %v614_v61, %v613_v62 }
 0x3ae   : > { %v601_v48 = vmax.f32 %v597_v42, 0.0 }
 0x3b0   : > { %v607_v53 = vpack.c.bf16 %v601_v48, %v601_v48 }
 0x3b1   : > { %v568_v46 = vpop.f32.mrf.mxu1 }
 0x3b2   : > { %v574_v49 = vmul.f32 %v568_v46, %v1021_v44  ;;  %v615_v58 = vunpack.c.l.b16 %v607_v53 }
 0x3b4   : > { %v598_v51 = vadd.f32 %v593_v35, %v574_v49 }
 0x3b6   : > { %v602_v54 = vmax.f32 %v598_v51, 0.0 }
 0x3b8   : > { %v608_v56 = vpack.c.bf16 %v602_v54, %v602_v54 }
 0x3ba   : > { %v616_v59 = vunpack.c.l.b16 %v608_v56 }
 0x3bc   : > { %v618_v60 = vpack.c.b16 %v616_v59, %v615_v58 }
 0x3be   : > { %631 = vmatpush.bf16.msrb.mxu2 %v618_v60 }
 0x3c2   : > { %632 = vmatpush.bf16.msrb.mxu2 %v617_v63 }
 0x3c5   : > { %778 = vmatmul.msk.bf16.vlgmr.msrb.gmra.mxu2 %vm621_vm10, %v603_v0 }
 0x448   : > { %v634_v1 = vpop.f32.mrf.mxu2 }
 0x449   : > { %v638_v2 = vmul.f32 %v634_v1, %v1021_v44 }
 0x44b   : > { %v639_v3 = vpack.c.bf16 %v638_v2, %v638_v2 }
 0x44d   : > { %779 = vmatmul.msk.bf16.vlgmr.msrb.gmra.mxu0 %vm322_vm0, %v639_v3 }
 0x450   : > { %v636_v4 = vpop.f32.mrf.mxu2 }
 0x4ca   : > { %v652_v5 = vpop.f32.mrf.mxu0 }
 0x4cb   : > { %v656_v6 = vmul.f32 %v652_v5, %v1021_v44 }
 0x4cd   : > { %v662_v8 = vadd.f32 %v660_v7, %v656_v6 }
 0x4cf   : > { %v663_v9 = vmax.f32 %v662_v8, 0.0 }
 0x4d1   : > { %664 = vst.msk [vmem:[%s309_s10] sm:$0xff] %vm322_vm0, %v663_v9 }
 0x4d2   : > { %v654_v10 = vpop.f32.mrf.mxu0 }
 0x4d3   : > { %861 = shalt.err (!%p858_p3)
}
 0x4d4   : > { %787 = dma.vmem_to_hbm [thread:$0]  (%p982_p5), %s679_s12, 128, %s681_s13, %s666_s9  }
 0x4d5 PF: > { %p793_p4 = scmp.ge.s32.totalorder %s896_s30, 2  ;;  %s692_s21 = sand.u32 1, %s884_s27  }
 0x4d6   : > { %s693_s25 = scalar_lea.sflag [#allocation3], %s692_s21 }
 0x4d7   : > { %p790_p7 = pnand %p793_p4, %p986_p6 }
 0x4d9   : > { %p791_p8 = pneg %p790_p7 }
 0x4db   : > { %879 = dma.done.wait (%p791_p8), %s693_s25, 128  }
 0x4dc   : > { %881 = vsyncadd (%p791_p8), %s693_s25, 4294967168  ;;  %p18_p9 = scmp.ge.s32.totalorder %s969_s11, 4   ;;  %s1105_s27 = smov %s888_s28 }
 0x4dd   : > { %s1106_s28 = smov %s892_s29  ;;  %s1107_s29 = smov %s980_s14 }
 0x4de   : > { %s1108_s30 = smov %s969_s11  ;;  %20 = sbr.rel (!%p18_p9) target bundleno = 3 (0x3), region = 90 }
 0x4e3   :  { %699 = vsyncpa [#allocation3], 1 }
 0x4e4   :  { %701 = vsyncpa [#allocation3 + $0x1], 1 }

</bundles_post_ra>
